<compile_context>
chip_gen: v7x
topology: tpu7x:2x2x1
jax: 0.10.0
libtpu: 0.0.40
codegen_flags: <defaults>
</compile_context>

<pallas_src>
import numpy as np
import jax
import jax.numpy as jnp
from jax.experimental import pallas as pl
from jax.experimental.pallas import tpu as pltpu


def f64_to_f32_kernel(w_ref, o_ref):
    u = jnp.uint32
    lo = w_ref[0]                      # f64 bits [31:0]
    hi = w_ref[1]                      # sign(1) | exp(11) | mant[51:32]

    sign = hi & u(0x80000000)
    exp64 = (hi >> u(20)) & u(0x7FF)
    mant_hi = hi & u(0x000FFFFF)

    # Top 23 f64-mantissa bits; round-to-nearest-even with a single bias-add:
    # the carry out of bit 29 is the rounding increment.
    mant23 = (mant_hi << u(3)) | (lo >> u(29))
    inc = ((lo & u(0x1FFFFFFF)) + (mant23 & u(1)) + u(0x0FFFFFFF)) >> u(29)
    mant23r = mant23 + inc             # may be 0x800000; carry folds into exponent below

    # Exponent rebias 1023 -> 127 in uint32 (wraps for underflow lanes; those
    # are overwritten below).  Adding the rounded mantissa lets a mantissa
    # carry bump the exponent naturally (even 254 -> 255 yields a correct inf).
    exp32 = exp64 - u(896)
    bits = sign | ((exp32 << u(23)) + mant23r)

    # Out-of-range lanes via unsigned wrap-around range tests:
    #   overflow : exp32 in [255, 1151]  (includes f64 Inf/NaN at 1151)
    #   underflow: exp32 == 0 or wrapped-negative -> signed zero
    is_over = (exp32 - u(255)) < u(897)
    is_under = (exp32 - u(1)) >= u(1151)
    is_nan = (exp64 == u(0x7FF)) & ((mant_hi | lo) != u(0))
    over_bits = sign | jnp.where(is_nan, u(0x7FC00000), u(0x7F800000))
    bits = jnp.where(is_over, over_bits, bits)
    # TODO(synk): f32 subnormal results (|x| < ~1.18e-38) flush to signed zero
    # instead of gradual underflow.
    bits = jnp.where(is_under, sign, bits)

    o_ref[...] = pltpu.bitcast(bits, jnp.float32)


_LANE = 1024                       # output lane width (large multiple of 128)
_BYTES_PER_ROW = 12 * _LANE        # 8 KiB input words + 4 KiB output per padded row
_MIN_BLOCK = 256 * 1024            # pipeline floor (per-step overhead stays tiny)
_MAX_BLOCK = 4 * 1024 * 1024       # single-copy cap -> ~8.5 MiB double-buffered VMEM
_TARGET_STEPS = 8


def _tiling(n_elems):
    """Returns (grid steps, rows per block) for the flattened (rows, _LANE) problem."""
    rows = -(-n_elems // _LANE)
    if rows <= 8:
        return 1, 8
    blk = min(max(rows * _BYTES_PER_ROW // _TARGET_STEPS, _MIN_BLOCK), _MAX_BLOCK)
    tile_cap = max(8, (blk // _BYTES_PER_ROW) // 8 * 8)
    steps = -(-rows // tile_cap)
    steps += steps & 1                       # even (>= 2): keeps both v7x TCs busy
    tile_r = (-(-rows // steps) + 7) // 8 * 8
    return steps, tile_r


def f64_to_f32(x_np):
    """x_np: numpy float64 array (R, C). Returns a float32 jax array (R, C)."""
    x_np = np.ascontiguousarray(x_np, dtype=np.float64)
    if not np.little_endian:
        raise NotImplementedError("f64 bit view assumes a little-endian host")
    R, C = x_np.shape
    N = R * C

    steps, tile_r = _tiling(N)
    rows_pad = steps * tile_r

    # Zero-copy host bit view: interleaved (lo, hi) uint32 words -> one H2D copy.
    flat = x_np.reshape(-1).view(np.uint32)              # (2N,)
    words = jnp.asarray(flat)
    # Device-side pad + lo/hi de-interleave into lane-dense planes (2, rows, LANE).
    words = jnp.pad(words, (0, 2 * (rows_pad * _LANE - N)))
    words = words.reshape(rows_pad * _LANE, 2).T.reshape(2, rows_pad, _LANE)

    out = pl.pallas_call(
        f64_to_f32_kernel,
        out_shape=jax.ShapeDtypeStruct((rows_pad, _LANE), jnp.float32),
        grid_spec=pltpu.PrefetchScalarGridSpec(
            num_scalar_prefetch=0,
            grid=(steps,),
            in_specs=[pl.BlockSpec((2, tile_r, _LANE), lambda i: (0, i, 0))],
            out_specs=pl.BlockSpec((tile_r, _LANE), lambda i: (i, 0)),
        ),
        compiler_params=pltpu.CompilerParams(
            dimension_semantics=("parallel",)),
    )(words)

    return out.reshape(-1)[:N].reshape(R, C)


if __name__ == "__main__":
    key = jax.random.PRNGKey(0)
    k1, k2, k3 = jax.random.split(key, 3)
    R, C = 64, 200     # small; C deliberately NOT a multiple of 128

    # float64 input whose mantissa has bits beyond f32 precision so the
    # in-kernel rounding path is actually exercised.
    base = np.asarray(jax.random.normal(k1, (R, C), dtype=jnp.float32), dtype=np.float64)
    extra = np.asarray(jax.random.normal(k2, (R, C), dtype=jnp.float32), dtype=np.float64)
    scale = np.asarray(jax.random.uniform(k3, (R, C), dtype=jnp.float32,
                                          minval=-8.0, maxval=8.0), dtype=np.float64)
    x_np = base * np.exp2(np.round(scale)) + extra * 1e-9

    # Special-case paths: inf / nan / f32 overflow / signed zero.
    x_np[0, 0] = np.inf
    x_np[0, 1] = -np.inf
    x_np[0, 2] = np.nan
    x_np[0, 3] = 1e300      # overflows f32 -> +inf
    x_np[0, 4] = -1e300     # -> -inf
    x_np[0, 5] = 0.0
    x_np[0, 6] = -0.0

    out = f64_to_f32(x_np)
    out = jax.block_until_ready(out)

    with np.errstate(over="ignore"):
        expected = x_np.astype(np.float32)   # numpy RNE == torch .to(float32)
    np.testing.assert_array_equal(np.asarray(out), expected)
    assert out.dtype == jnp.float32

    print("KERNEL_OK")
</pallas_src>

<mosaic_0001>
module attributes {stable_mosaic.version = 11 : i64} {
  func.func @f64_to_f32_kernel(%arg0: i32, %arg1: memref<2x8x1024xi32, #tpu.memory_space<vmem>>, %arg2: memref<8x1024xf32, #tpu.memory_space<vmem>>) attributes {dimension_semantics = [#tpu.dimension_semantics<parallel>], iteration_bounds = array<i64: 2>, scalar_prefetch = 0 : i64, scratch_operands = 0 : i64, tpu.core_type = #tpu.core_type<tc>, window_params = [{transform_indices = @transform_0, window_bounds = array<i64: 2, 8, 1024>}, {transform_indices = @transform_1, window_bounds = array<i64: 8, 1024>}]} {
    %c0 = arith.constant 0 : index
    %c0_0 = arith.constant 0 : index
    %c0_1 = arith.constant 0 : index
    %0 = vector.load %arg1[%c0, %c0_0, %c0_1] : memref<2x8x1024xi32, #tpu.memory_space<vmem>>, vector<1x8x1024xi32>
    %1 = vector.shape_cast %0 : vector<1x8x1024xi32> to vector<8x1024xi32>
    %c1 = arith.constant 1 : index
    %c0_2 = arith.constant 0 : index
    %c0_3 = arith.constant 0 : index
    %2 = vector.load %arg1[%c1, %c0_2, %c0_3] : memref<2x8x1024xi32, #tpu.memory_space<vmem>>, vector<1x8x1024xi32>
    %3 = vector.shape_cast %2 : vector<1x8x1024xi32> to vector<8x1024xi32>
    %c-2147483648_i32 = arith.constant -2147483648 : i32
    %4 = vector.broadcast %c-2147483648_i32 : i32 to vector<8x1024xi32>
    %5 = arith.andi %3, %4 : vector<8x1024xi32>
    %c20_i32 = arith.constant 20 : i32
    %6 = vector.broadcast %c20_i32 : i32 to vector<8x1024xi32>
    %7 = arith.shrui %3, %6 : vector<8x1024xi32>
    %c2047_i32 = arith.constant 2047 : i32
    %8 = vector.broadcast %c2047_i32 : i32 to vector<8x1024xi32>
    %9 = arith.andi %7, %8 : vector<8x1024xi32>
    %c1048575_i32 = arith.constant 1048575 : i32
    %10 = vector.broadcast %c1048575_i32 : i32 to vector<8x1024xi32>
    %11 = arith.andi %3, %10 : vector<8x1024xi32>
    %c3_i32 = arith.constant 3 : i32
    %12 = vector.broadcast %c3_i32 : i32 to vector<8x1024xi32>
    %13 = arith.shli %11, %12 : vector<8x1024xi32>
    %c29_i32 = arith.constant 29 : i32
    %14 = vector.broadcast %c29_i32 : i32 to vector<8x1024xi32>
    %15 = arith.shrui %1, %14 : vector<8x1024xi32>
    %16 = arith.ori %13, %15 : vector<8x1024xi32>
    %c536870911_i32 = arith.constant 536870911 : i32
    %17 = vector.broadcast %c536870911_i32 : i32 to vector<8x1024xi32>
    %18 = arith.andi %1, %17 : vector<8x1024xi32>
    %c1_i32 = arith.constant 1 : i32
    %19 = vector.broadcast %c1_i32 : i32 to vector<8x1024xi32>
    %20 = arith.andi %16, %19 : vector<8x1024xi32>
    %21 = arith.addi %18, %20 : vector<8x1024xi32>
    %c268435455_i32 = arith.constant 268435455 : i32
    %22 = vector.broadcast %c268435455_i32 : i32 to vector<8x1024xi32>
    %23 = arith.addi %21, %22 : vector<8x1024xi32>
    %c29_i32_4 = arith.constant 29 : i32
    %24 = vector.broadcast %c29_i32_4 : i32 to vector<8x1024xi32>
    %25 = arith.shrui %23, %24 : vector<8x1024xi32>
    %26 = arith.addi %16, %25 : vector<8x1024xi32>
    %c896_i32 = arith.constant 896 : i32
    %27 = vector.broadcast %c896_i32 : i32 to vector<8x1024xi32>
    %28 = arith.subi %9, %27 : vector<8x1024xi32>
    %c23_i32 = arith.constant 23 : i32
    %29 = vector.broadcast %c23_i32 : i32 to vector<8x1024xi32>
    %30 = arith.shli %28, %29 : vector<8x1024xi32>
    %31 = arith.addi %30, %26 : vector<8x1024xi32>
    %32 = arith.ori %5, %31 : vector<8x1024xi32>
    %c255_i32 = arith.constant 255 : i32
    %33 = vector.broadcast %c255_i32 : i32 to vector<8x1024xi32>
    %34 = arith.subi %28, %33 : vector<8x1024xi32>
    %c897_i32 = arith.constant 897 : i32
    %35 = vector.broadcast %c897_i32 : i32 to vector<8x1024xi32>
    %36 = arith.cmpi ult, %34, %35 : vector<8x1024xi32>
    %c1_i32_5 = arith.constant 1 : i32
    %37 = vector.broadcast %c1_i32_5 : i32 to vector<8x1024xi32>
    %38 = arith.subi %28, %37 : vector<8x1024xi32>
    %c1151_i32 = arith.constant 1151 : i32
    %39 = vector.broadcast %c1151_i32 : i32 to vector<8x1024xi32>
    %40 = arith.cmpi uge, %38, %39 : vector<8x1024xi32>
    %c2047_i32_6 = arith.constant 2047 : i32
    %41 = vector.broadcast %c2047_i32_6 : i32 to vector<8x1024xi32>
    %42 = arith.cmpi eq, %9, %41 : vector<8x1024xi32>
    %43 = arith.ori %11, %1 : vector<8x1024xi32>
    %c0_i32 = arith.constant 0 : i32
    %44 = vector.broadcast %c0_i32 : i32 to vector<8x1024xi32>
    %45 = arith.cmpi ne, %43, %44 : vector<8x1024xi32>
    %46 = arith.andi %42, %45 : vector<8x1024xi1>
    %c2143289344_i32 = arith.constant 2143289344 : i32
    %c2139095040_i32 = arith.constant 2139095040 : i32
    %47 = vector.broadcast %c2143289344_i32 : i32 to vector<8x1024xi32>
    %48 = vector.broadcast %c2139095040_i32 : i32 to vector<8x1024xi32>
    %49 = arith.select %46, %47, %48 : vector<8x1024xi1>, vector<8x1024xi32>
    %50 = arith.ori %5, %49 : vector<8x1024xi32>
    %51 = arith.select %36, %50, %32 : vector<8x1024xi1>, vector<8x1024xi32>
    %52 = arith.select %40, %5, %51 : vector<8x1024xi1>, vector<8x1024xi32>
    %53 = tpu.bitcast %52 : vector<8x1024xi32> -> vector<8x1024xf32>
    %c0_7 = arith.constant 0 : index
    %c0_8 = arith.constant 0 : index
    %54 = vector.load %arg2[%c0_7, %c0_8] : memref<8x1024xf32, #tpu.memory_space<vmem>>, vector<8x1024xf32>
    tpu.vector_store %arg2[%c0_7, %c0_8], %53 {strides = array<i32>} : memref<8x1024xf32, #tpu.memory_space<vmem>>, vector<8x1024xf32>,
    return
  }
  func.func @transform_0(%arg0: i32) -> (i32, i32, i32) {
    %c0_i32 = arith.constant 0 : i32
    %c0_i32_0 = arith.constant 0 : i32
    %c0_i32_1 = arith.constant 0 : i32
    return %c0_i32, %arg0, %c0_i32_0 : i32, i32, i32
  }
  func.func @transform_1(%arg0: i32) -> (i32, i32) {
    %c0_i32 = arith.constant 0 : i32
    %c0_i32_0 = arith.constant 0 : i32
    return %arg0, %c0_i32 : i32, i32
  }
}

</mosaic_0001>

<bundles_post_ra>
// kernel: tpu_custom_call.1
= control target key start
LH: loop header
LB: loop body
LE: loop exit
PB: predicated region body
PF: predicated region fallthrough
CT: control target
= control target key end

     0   :  { %6 = vsyncpa [#allocation3], 0  ;;  %s912_s0 = inlined_call_operand.hbm [shape: u32[2,16,1024], index: 0, kind: input, shape index: {}]   ;;  %s913_s1 = inlined_call_operand.hbm [shape: f32[16,1024], index: 1, kind: output, shape index: {}]  }
   0x1   :  { %8 = vsyncpa [#allocation3 + $0x1], 0 }
   0x2   :  { %9 = vsyncpa [#allocation4], 0 }
   0x3   :  { %11 = vsyncpa [#allocation4 + $0x1], 0  ;;  %s697_s6 = smov 0   ;;  %s699_s7 = smov 0  }
   0x4   :  { %s701_s8 = smov 0   ;;  %s703_s9 = smov 0  }
   0x5 LB: > { %s718_s10 = sadd.s32 4294967295, %s679_s9   ;;  %s485_s11 = sadd.s32 4294967294, %s679_s9   ;;  %s679_s9 = sphi %s703_s9, %s927_s9   ;;  %s675_s8 = sphi %s701_s8, %s926_s8   ;;  %s671_s7 = sphi %s699_s7, %s925_s7   ;;  %s667_s6 = sphi %s697_s6, %s924_s6  }
   0x6   : > { %s722_s12 = sadd.s32 1, %s679_s9   ;;  %s24_s13 = sadd.s32 1, %s675_s8 }
   0x7   : > { %s21_s14 = ssub.s32 %s679_s9, %s722_s12  ;;  %p31_p0 = scmp.ne.s32.totalorder %s675_s8, %s671_s7 }
   0x8   : > { %p22_p1 = scmp.eq.s32.totalorder %s21_s14, 0  ;;  %p32_p2 = scmp.eq.s32.totalorder %s679_s9, 0 }
   0x9   : > { %p37_p3 = scmp.ne.s32.totalorder %s671_s7, %s667_s6  ;;  %p38_p4 = scmp.eq.s32.totalorder %s718_s10, 0 }
   0xa   : > { %s734_s15 = scalar_select %p22_p1, %s675_s8, %s24_s13  }
   0xb   : > { %p736_p5 = por %p32_p2, %p31_p0  ;;  %p740_p6 = por %p38_p4, %p37_p3 }
   0xc   : > { %p61_p7 = scmp.eq.s32.totalorder %s718_s10, 1  ;;  %p67_p8 = scmp.eq.s32.totalorder %s485_s11, 1 }
   0xd   : > { %p545_p10 = scmp.lt.s32.totalorder %s679_s9, 2  ;;  %s87_s20 = sand.u32 1, %s675_s8  }
   0xe   : > { %p747_p11 = por %p61_p7, %p31_p0  ;;  %p751_p12 = por %p67_p8, %p37_p3 }
   0xf   : > { %s531_s21 = sshll.u32 %s679_s9, 10  ;;  %s488_s22 = sshll.u32 %s87_s20, 7 }
  0x10   : > { %s917_s18 = scalar_select %p747_p11, 1, 0 }
  0x11   : > { %s918_s19 = scalar_select %p751_p12, 1, 0 }
  0x12   : > { %s760_s25 = scalar_lea.hbm %s912_s0, %s531_s21  ;;  %s91_s26 = scalar_lea.vmem [#allocation2], %s488_s22 }
  0x13   : > { %s98_s27 = sshll.u32 %s91_s26, 4  ;;  %p764_p13 = pnand %p545_p10, %p736_p5  ;;  %s768_s27 = int_to_ptr.vmem [resolvable:$true] %s98_s27 }
  0x14   : > { %s771_s29 = scalar_lea.sflag [#allocation3], %s87_s20  ;;  %s583_s30 = scalar_lea.hbm %s760_s25, 2048 }
  0x15   : > { %p584_p1 = scmp.ne.s32.totalorder %s760_s25, %s583_s30  ;;  %p585_p2 = pneg %p764_p13 }
  0x16   : > { %s588_s4 = scalar_lea.hbm %s912_s0, 4096  ;;  %p589_p5 = scmp.lt.u32.totalorder %s760_s25, %s912_s0 }
  0x17   : > { %p586_p3 = pnand %p585_p2, %p584_p1  ;;  %p590_p7 = scmp.lt.u32.totalorder %s588_s4, %s583_s30 }
  0x18   : > { %p592_p10 = scmp.lt.u32.totalorder %s583_s30, %s760_s25 }
  0x19   : > { %p587_p4 = pneg %p586_p3  ;;  %p591_p8 = por %p590_p7, %p589_p5 }
  0x1b   : > { %p593_p9 = por %p592_p10, %p591_p8 }
  0x1d   : > { %p594_p0 = pnand %p593_p9, %p587_p4 }
  0x1f   : > { %597 = shalt.err (!%p594_p0)
}
  0x20   : > { %s598_s13 = scalar_lea.vmem %s768_s27, 2048  ;;  %s681_s14 = smov [#allocation2]  }
  0x21   : > { %p599_p1 = scmp.ne.s32.totalorder %s768_s27, %s598_s13  ;;  %s603_s16 = sshll.u32 %s681_s14, 4  ;;  %s604_s16 = int_to_ptr.vmem [resolvable:$false] %s603_s16 }
  0x22   : > { %s605_s20 = scalar_lea.vmem %s604_s16, 4096  ;;  %p606_p11 = scmp.lt.s32.totalorder %s768_s27, %s604_s16 }
  0x23   : > { %p601_p3 = pnand %p599_p1, %p585_p2  ;;  %p607_p5 = scmp.lt.s32.totalorder %s605_s20, %s598_s13 }
  0x25   : > { %p602_p12 = pneg %p601_p3  ;;  %p608_p7 = por %p607_p5, %p606_p11 }
  0x27   : > { %p609_p8 = pnand %p608_p7, %p602_p12 }
  0x29   : > { %612 = shalt.err (!%p609_p8)
}
  0x2a   : > { %s682_s21 = smov 2048   ;;  %s683_s22 = smov 1024  }
  0x2b   : > { %s684_s23 = smov 64   ;;  %p106_p9 = scmp.lt.s32.totalorder %s679_s9, 3 }
  0x2c   : > { %540 = dma.hbm_to_vmem [thread:$0]  (!%p764_p13), %s760_s25, 2048, %s768_s27, %s771_s29, %s682_s21, %s683_s22, %s684_s23  }
  0x2d   : > { %p920_p0 = scmp.ge.s32.totalorder %s679_s9, 1 }
  0x2f   : > { %p107_p2 = pnand %p920_p0, %p106_p9 }
  0x30   : > { %s803_s24 = sand.u32 (!%p107_p2), 1, %s671_s7  }
  0x31   : > { %110 = sbr.rel (%p107_p2) target bundleno = 137 (0x89), region = 24  ;;  %s492_s26 = sshll.u32 (!%p107_p2), %s803_s24, 7 }
  0x32   : > { %s113_s30 = scalar_lea.sflag (!%p107_p2), [#allocation3], %s803_s24  ;;  %s807_s2 = scalar_lea.vmem (!%p107_p2), [#allocation2], %s492_s26 }
  0x38   : > { %658 = dma.done.wait (%p740_p6), %s113_s30, 2048  }
  0x39   : > { %660 = vsyncadd (%p740_p6), %s113_s30, 4294965248  ;;  %v135_v0 = vld [vmem:[%s807_s2] sm:$0xff]  ;;  %v136_v2 = vld [vmem:[%s807_s2 + $0x8] sm:$0xff]  ;;  %v685_v31 = vmov 2139095040   ;;  %s493_s17 = sshll.u32 %s803_s24, 6  ;;  %s532_s27 = sshll.u32 %s718_s10, 10 }
  0x3a   : > { %v494_v1 = vld [vmem:[%s807_s2 + $0x40] sm:$0xff]  ;;  %v192_v5 = vshrl.u32 %v135_v0, 29  ;;  %v495_v6 = vld [vmem:[%s807_s2 + $0x48] sm:$0xff]  ;;  %v193_v12 = vshrl.u32 %v136_v2, 29  ;;  %v208_v13 = vand.u32 536870911, %v135_v0  ;;  %s867_s4 = scalar_lea.hbm %s913_s1, %s532_s27 }
  0x3b   : > { %v160_v3 = vshrl.u32 %v494_v1, 20  ;;  %v176_v4 = vand.u32 1048575, %v494_v1  ;;  %v161_v7 = vshrl.u32 %v495_v6, 20  ;;  %v177_v8 = vand.u32 1048575, %v495_v6  ;;  %v137_v28 = vld [vmem:[%s807_s2 + $0x10] sm:$0xff]  ;;  %v497_v42 = vld [vmem:[%s807_s2 + $0x58] sm:$0xff] }
  0x3c   : > { %v209_v20 = vand.u32 536870911, %v136_v2  ;;  %v817_v23 = vand.u32 2147483648, %v494_v1  ;;  %v496_v29 = vld [vmem:[%s807_s2 + $0x50] sm:$0xff]  ;;  %v153_v33 = vand.u32 2147483648, %v495_v6  ;;  %v194_v41 = vshrl.u32 %v137_v28, 29 }
  0x3d   : > { %v168_v9 = vand.u32 2047, %v160_v3  ;;  %v184_v10 = vshll.u32 %v176_v4, 3  ;;  %v328_v11 = vor.u32 %v176_v4, %v135_v0  ;;  %v169_v14 = vand.u32 2047, %v161_v7  ;;  %v138_v59 = vld [vmem:[%s807_s2 + $0x18] sm:$0xff]  ;;  %s834_s25 = scalar_lea.vmem [#allocation5], %s493_s17  ;;  %s401_s5 = scalar_lea.sflag [#allocation4], %s803_s24 }
  0x3e   : > { %v185_v15 = vshll.u32 %v177_v8, 3  ;;  %v329_v17 = vor.u32 %v177_v8, %v136_v2  ;;  %v162_v38 = vshrl.u32 %v496_v29, 20  ;;  %v178_v40 = vand.u32 1048575, %v496_v29  ;;  %s415_s28 = sshll.u32 %s834_s25, 4  ;;  %p921_p11 = scmp.ne.s32.totalorder %s917_s18, 0  ;;  %s869_s28 = int_to_ptr.vmem [resolvable:$true] %s415_s28 }
  0x3f   : > { %v200_v16 = vor.u32 %v192_v5, %v184_v10  ;;  %vm320_vm0 = vcmp.eq.s32.totalorder %v168_v9, 2047  ;;  %vm336_vm1 = vcmp.ne.s32.totalorder %v328_v11, 0  ;;  %v502_v18 = vadd.s32 4294966400, %v168_v9  ;;  %s613_s11 = scalar_lea.vmem %s869_s28, 1024  ;;  %s686_s10 = smov [#allocation5]  }
  0x40   : > { %v201_v19 = vor.u32 %v193_v12, %v185_v15  ;;  %vm344_vm2 = vmand %vm320_vm0, %vm336_vm1  ;;  %v503_v22 = vadd.s32 4294966400, %v169_v14  ;;  %vm321_vm3 = vcmp.eq.s32.totalorder %v169_v14, 2047  ;;  %vm337_vm4 = vcmp.ne.s32.totalorder %v329_v17, 0  ;;  %v498_v15 = vld [vmem:[%s807_s2 + $0x60] sm:$0xff]  ;;  %p614_p6 = scmp.ne.s32.totalorder %s869_s28, %s613_s11  ;;  %s617_s13 = sshll.u32 %s686_s10, 4  ;;  %s618_s13 = int_to_ptr.vmem [resolvable:$false] %s617_s13 }
  0x41   : > { %v216_v21 = vand.u32 1, %v200_v16  ;;  %v510_v24 = vadd.s32 4294967041, %v502_v18  ;;  %v518_v27 = vadd.s32 4294967295, %v502_v18  ;;  %v264_v30 = vshll.u32 %v502_v18, 23  ;;  %vm345_vm6 = vmand %vm321_vm3, %vm337_vm4  ;;  %s619_s14 = scalar_lea.vmem %s618_s13, 2048  ;;  %p620_p4 = scmp.lt.s32.totalorder %s869_s28, %s618_s13 }
  0x42   : > { %v217_v25 = vand.u32 1, %v201_v19  ;;  %v352_v32 = vsel %vm344_vm2, 2143289344, %v685_v31  ;;  %v265_v36 = vshll.u32 %v503_v22, 23  ;;  %v511_v37 = vadd.s32 4294967041, %v503_v22  ;;  %p615_p12 = pnand %p614_p6, %p921_p11  ;;  %p621_p10 = scmp.lt.s32.totalorder %s619_s14, %s613_s11 }
  0x43   : > { %v224_v26 = vadd.s32 %v216_v21, %v208_v13  ;;  %vm296_vm5 = vcmp.lt.u32.totalorder %v510_v24, 897  ;;  %vm312_vm7 = vcmp.ge.u32.totalorder %v518_v27, 1151  ;;  %v360_v44 = vor.u32 %v352_v32, %v817_v23  ;;  %v499_v32 = vld [vmem:[%s807_s2 + $0x68] sm:$0xff] }
  0x44   : > { %v225_v34 = vadd.s32 %v217_v25, %v209_v20  ;;  %v170_v45 = vand.u32 2047, %v162_v38  ;;  %v519_v47 = vadd.s32 4294967295, %v503_v22  ;;  %v186_v48 = vshll.u32 %v178_v40, 3  ;;  %p616_p13 = pneg %p615_p12  ;;  %p622_p1 = por %p621_p10, %p620_p4 }
  0x45   : > { %v232_v35 = vadd.s32 268435455, %v224_v26  ;;  %v330_v49 = vor.u32 %v178_v40, %v137_v28  ;;  %v353_v51 = vsel %vm345_vm6, 2143289344, %v685_v31  ;;  %v163_v52 = vshrl.u32 %v497_v42, 20 }
  0x46   : > { %v233_v39 = vadd.s32 268435455, %v225_v34  ;;  %v179_v53 = vand.u32 1048575, %v497_v42  ;;  %v202_v55 = vor.u32 %v194_v41, %v186_v48  ;;  %v210_v56 = vand.u32 536870911, %v137_v28  ;;  %v140_v48 = vld [vmem:[%s807_s2 + $0x28] sm:$0xff]  ;;  %p623_p3 = pnand %p622_p1, %p616_p13 }
  0x47   : > { %v240_v43 = vshrl.u32 %v232_v35, 29  ;;  %v504_v57 = vadd.s32 4294966400, %v170_v45  ;;  %vm297_vm8 = vcmp.lt.u32.totalorder %v511_v37, 897  ;;  %vm322_vm9 = vcmp.eq.s32.totalorder %v170_v45, 2047 }
  0x48   : > { %v241_v46 = vshrl.u32 %v233_v39, 29  ;;  %vm338_vm10 = vcmp.ne.s32.totalorder %v330_v49, 0  ;;  %v361_v61 = vor.u32 %v353_v51, %v153_v33  ;;  %v218_v62 = vand.u32 1, %v202_v55 }
  0x49   : > { %v248_v50 = vadd.s32 %v240_v43, %v200_v16  ;;  %v187_v63 = vshll.u32 %v179_v53, 3  ;;  %vm313_vm11 = vcmp.ge.u32.totalorder %v519_v47, 1151  ;;  %v154_v1 = vand.u32 2147483648, %v496_v29  ;;  %vm346_vm12 = vmand %vm322_vm9, %vm338_vm10 }
  0x4a   : > { %v249_v54 = vadd.s32 %v241_v46, %v201_v19  ;;  %v171_v2 = vand.u32 2047, %v163_v52  ;;  %v226_v4 = vadd.s32 %v218_v62, %v210_v56  ;;  %v266_v5 = vshll.u32 %v504_v57, 23  ;;  %v139_v19 = vld [vmem:[%s807_s2 + $0x20] sm:$0xff] }
  0x4b   : > { %v272_v58 = vadd.s32 %v264_v30, %v248_v50  ;;  %v195_v6 = vshrl.u32 %v138_v59, 29  ;;  %v512_v8 = vadd.s32 4294967041, %v504_v57  ;;  %v211_v9 = vand.u32 536870911, %v138_v59 }
  0x4c   : > { %v273_v60 = vadd.s32 %v265_v36, %v249_v54  ;;  %v331_v10 = vor.u32 %v179_v53, %v138_v59  ;;  %v234_v13 = vadd.s32 268435455, %v226_v4  ;;  %v520_v17 = vadd.s32 4294967295, %v504_v57 }
  0x4d   : > { %v280_v0 = vor.u32 %v272_v58, %v817_v23  ;;  %v203_v14 = vor.u32 %v195_v6, %v187_v63  ;;  %v354_v18 = vsel %vm346_vm12, 2143289344, %v685_v31  ;;  %vm323_vm13 = vcmp.eq.s32.totalorder %v171_v2, 2047 }
  0x4e   : > { %v281_v3 = vor.u32 %v273_v60, %v153_v33  ;;  %v242_v20 = vshrl.u32 %v234_v13, 29  ;;  %v505_v22 = vadd.s32 4294966400, %v171_v2  ;;  %vm339_vm14 = vcmp.ne.s32.totalorder %v331_v10, 0  ;;  %v141_v10 = vld [vmem:[%s807_s2 + $0x30] sm:$0xff] }
  0x4f   : > { %v368_v7 = vsel %vm296_vm5, %v360_v44, %v280_v0  ;;  %v219_v21 = vand.u32 1, %v203_v14  ;;  %v180_v24 = vand.u32 1048575, %v498_v15  ;;  %v155_v26 = vand.u32 2147483648, %v497_v42  ;;  %vm347_vm15 = vmand %vm323_vm13, %vm339_vm14 }
  0x50   : > { %v376_v11 = vsel %vm312_vm7, %v817_v23, %v368_v7  ;;  %v369_v12 = vsel %vm297_vm8, %v361_v61, %v281_v3  ;;  %v164_v23 = vshrl.u32 %v498_v15, 20  ;;  %v250_v25 = vadd.s32 %v242_v20, %v202_v55 }
  0x51   : > { %392 = vst [vmem:[%s834_s25] sm:$0xff] %v376_v11  ;;  %v377_v16 = vsel %vm313_vm11, %v153_v33, %v369_v12  ;;  %v227_v27 = vadd.s32 %v219_v21, %v211_v9  ;;  %v196_v28 = vshrl.u32 %v139_v19, 29  ;;  %vm298_vm0 = vcmp.lt.u32.totalorder %v512_v8, 897 }
  0x52   : > { %393 = vst [vmem:[%s834_s25 + $0x8] sm:$0xff] %v377_v16  ;;  %vm314_vm1 = vcmp.ge.u32.totalorder %v520_v17, 1151  ;;  %v362_v29 = vor.u32 %v354_v18, %v154_v1  ;;  %v188_v30 = vshll.u32 %v180_v24, 3  ;;  %v274_v33 = vadd.s32 %v266_v5, %v250_v25  ;;  %v500_v5 = vld [vmem:[%s807_s2 + $0x70] sm:$0xff] }
  0x53   : > { %v235_v34 = vadd.s32 268435455, %v227_v27  ;;  %v267_v35 = vshll.u32 %v505_v22, 23  ;;  %v332_v36 = vor.u32 %v180_v24, %v139_v19  ;;  %v355_v37 = vsel %vm347_vm15, 2143289344, %v685_v31 }
  0x54   : > { %v172_v38 = vand.u32 2047, %v164_v23  ;;  %v204_v39 = vor.u32 %v196_v28, %v188_v30  ;;  %v212_v40 = vand.u32 536870911, %v139_v19  ;;  %v282_v41 = vor.u32 %v274_v33, %v154_v1  ;;  %v501_v30 = vld [vmem:[%s807_s2 + $0x78] sm:$0xff] }
  0x55   : > { %v243_v42 = vshrl.u32 %v235_v34, 29  ;;  %v165_v43 = vshrl.u32 %v499_v32, 20  ;;  %v181_v44 = vand.u32 1048575, %v499_v32  ;;  %v513_v45 = vadd.s32 4294967041, %v505_v22 }
  0x56   : > { %v521_v46 = vadd.s32 4294967295, %v505_v22  ;;  %v220_v47 = vand.u32 1, %v204_v39  ;;  %v370_v49 = vsel %vm298_vm0, %v362_v29, %v282_v41  ;;  %vm324_vm2 = vcmp.eq.s32.totalorder %v172_v38, 2047  ;;  %v142_v29 = vld [vmem:[%s807_s2 + $0x38] sm:$0xff] }
  0x57   : > { %v251_v50 = vadd.s32 %v243_v42, %v203_v14  ;;  %vm340_vm3 = vcmp.ne.s32.totalorder %v332_v36, 0  ;;  %v378_v51 = vsel %vm314_vm1, %v154_v1, %v370_v49  ;;  %v363_v52 = vor.u32 %v355_v37, %v155_v26 }
  0x58   : > { %v228_v53 = vadd.s32 %v220_v47, %v212_v40  ;;  %v506_v54 = vadd.s32 4294966400, %v172_v38  ;;  %394 = vst [vmem:[%s834_s25 + $0x10] sm:$0xff] %v378_v51  ;;  %v173_v56 = vand.u32 2047, %v165_v43  ;;  %v189_v57 = vshll.u32 %v181_v44, 3  ;;  %vm348_vm6 = vmand %vm324_vm2, %vm340_vm3 }
  0x59   : > { %v275_v55 = vadd.s32 %v267_v35, %v251_v50  ;;  %v197_v58 = vshrl.u32 %v140_v48, 29  ;;  %vm299_vm4 = vcmp.lt.u32.totalorder %v513_v45, 897  ;;  %vm315_vm5 = vcmp.ge.u32.totalorder %v521_v46, 1151 }
  0x5a   : > { %v156_v59 = vand.u32 2147483648, %v498_v15  ;;  %v236_v60 = vadd.s32 268435455, %v228_v53  ;;  %v213_v63 = vand.u32 536870911, %v140_v48  ;;  %v333_v0 = vor.u32 %v181_v44, %v140_v48 }
  0x5b   : > { %v283_v61 = vor.u32 %v275_v55, %v155_v26  ;;  %v205_v62 = vor.u32 %v197_v58, %v189_v57  ;;  %v268_v2 = vshll.u32 %v506_v54, 23  ;;  %v514_v3 = vadd.s32 4294967041, %v506_v54 }
  0x5c   : > { %v244_v1 = vshrl.u32 %v236_v60, 29  ;;  %v522_v4 = vadd.s32 4294967295, %v506_v54  ;;  %v356_v7 = vsel %vm348_vm6, 2143289344, %v685_v31  ;;  %v507_v9 = vadd.s32 4294966400, %v173_v56 }
  0x5d   : > { %v371_v6 = vsel %vm299_vm4, %v363_v52, %v283_v61  ;;  %v221_v8 = vand.u32 1, %v205_v62  ;;  %vm325_vm7 = vcmp.eq.s32.totalorder %v173_v56, 2047  ;;  %vm341_vm8 = vcmp.ne.s32.totalorder %v333_v0, 0 }
  0x5e   : > { %v379_v11 = vsel %vm315_vm5, %v155_v26, %v371_v6  ;;  %v252_v12 = vadd.s32 %v244_v1, %v204_v39  ;;  %v166_v14 = vshrl.u32 %v500_v5, 20  ;;  %v182_v15 = vand.u32 1048575, %v500_v5  ;;  %vm349_vm10 = vmand %vm325_vm7, %vm341_vm8 }
  0x5f   : > { %395 = vst [vmem:[%s834_s25 + $0x18] sm:$0xff] %v379_v11  ;;  %v229_v13 = vadd.s32 %v221_v8, %v213_v63  ;;  %v364_v17 = vor.u32 %v356_v7, %v156_v59  ;;  %v198_v18 = vshrl.u32 %v141_v10, 29  ;;  %vm300_vm9 = vcmp.lt.u32.totalorder %v514_v3, 897 }
  0x60   : > { %v276_v16 = vadd.s32 %v268_v2, %v252_v12  ;;  %v157_v19 = vand.u32 2147483648, %v499_v32  ;;  %v190_v21 = vshll.u32 %v182_v15, 3  ;;  %vm316_vm11 = vcmp.ge.u32.totalorder %v522_v4, 1151 }
  0x61   : > { %v237_v20 = vadd.s32 268435455, %v229_v13  ;;  %v269_v23 = vshll.u32 %v507_v9, 23  ;;  %v334_v24 = vor.u32 %v182_v15, %v141_v10  ;;  %v174_v26 = vand.u32 2047, %v166_v14 }
  0x62   : > { %v284_v22 = vor.u32 %v276_v16, %v156_v59  ;;  %v206_v27 = vor.u32 %v198_v18, %v190_v21  ;;  %v214_v28 = vand.u32 536870911, %v141_v10  ;;  %v515_v34 = vadd.s32 4294967041, %v507_v9 }
  0x63   : > { %v245_v25 = vshrl.u32 %v237_v20, 29  ;;  %v523_v35 = vadd.s32 4294967295, %v507_v9  ;;  %v357_v36 = vsel %vm349_vm10, 2143289344, %v685_v31  ;;  %vm326_vm12 = vcmp.eq.s32.totalorder %v174_v26, 2047 }
  0x64   : > { %v372_v33 = vsel %vm300_vm9, %v364_v17, %v284_v22  ;;  %v222_v38 = vand.u32 1, %v206_v27  ;;  %vm342_vm13 = vcmp.ne.s32.totalorder %v334_v24, 0  ;;  %v167_v39 = vshrl.u32 %v501_v30, 20 }
  0x65   : > { %v380_v32 = vsel %vm316_vm11, %v156_v59, %v372_v33  ;;  %v253_v37 = vadd.s32 %v245_v25, %v205_v62  ;;  %v183_v40 = vand.u32 1048575, %v501_v30  ;;  %v199_v41 = vshrl.u32 %v142_v29, 29  ;;  %vm350_vm0 = vmand %vm326_vm12, %vm342_vm13 }
  0x66   : > { %396 = vst [vmem:[%s834_s25 + $0x20] sm:$0xff] %v380_v32  ;;  %v365_v43 = vor.u32 %v357_v36, %v157_v19  ;;  %v230_v44 = vadd.s32 %v222_v38, %v214_v28  ;;  %v508_v45 = vadd.s32 4294966400, %v174_v26  ;;  %vm301_vm14 = vcmp.lt.u32.totalorder %v515_v34, 897 }
  0x67   : > { %v277_v42 = vadd.s32 %v269_v23, %v253_v37  ;;  %v191_v46 = vshll.u32 %v183_v40, 3  ;;  %vm317_vm15 = vcmp.ge.u32.totalorder %v523_v35, 1151  ;;  %v335_v49 = vor.u32 %v183_v40, %v142_v29 }
  0x68   : > { %v238_v48 = vadd.s32 268435455, %v230_v44  ;;  %v175_v50 = vand.u32 2047, %v167_v39  ;;  %v215_v52 = vand.u32 536870911, %v142_v29  ;;  %v158_v54 = vand.u32 2147483648, %v500_v5 }
  0x69   : > { %v285_v47 = vor.u32 %v277_v42, %v157_v19  ;;  %v207_v51 = vor.u32 %v199_v41, %v191_v46  ;;  %v270_v56 = vshll.u32 %v508_v45, 23  ;;  %v516_v58 = vadd.s32 4294967041, %v508_v45 }
  0x6a   : > { %v246_v55 = vshrl.u32 %v238_v48, 29  ;;  %v358_v59 = vsel %vm350_vm0, 2143289344, %v685_v31  ;;  %v524_v62 = vadd.s32 4294967295, %v508_v45  ;;  %vm327_vm1 = vcmp.eq.s32.totalorder %v175_v50, 2047 }
  0x6b   : > { %v373_v53 = vsel %vm301_vm14, %v365_v43, %v285_v47  ;;  %v223_v60 = vand.u32 1, %v207_v51  ;;  %vm343_vm2 = vcmp.ne.s32.totalorder %v335_v49, 0  ;;  %v509_v0 = vadd.s32 4294966400, %v175_v50 }
  0x6c   : > { %v381_v57 = vsel %vm317_vm15, %v157_v19, %v373_v53  ;;  %v254_v61 = vadd.s32 %v246_v55, %v206_v27  ;;  %v366_v2 = vor.u32 %v358_v59, %v158_v54  ;;  %vm302_vm3 = vcmp.lt.u32.totalorder %v516_v58, 897  ;;  %vm351_vm4 = vmand %vm327_vm1, %vm343_vm2 }
  0x6d   : > { %397 = vst [vmem:[%s834_s25 + $0x28] sm:$0xff] %v381_v57  ;;  %v231_v63 = vadd.s32 %v223_v60, %v215_v52  ;;  %vm318_vm5 = vcmp.ge.u32.totalorder %v524_v62, 1151  ;;  %v159_v5 = vand.u32 2147483648, %v501_v30  ;;  %v271_v7 = vshll.u32 %v509_v0, 23 }
  0x6e   : > { %v278_v1 = vadd.s32 %v270_v56, %v254_v61  ;;  %v517_v9 = vadd.s32 4294967041, %v509_v0  ;;  %v359_v10 = vsel %vm351_vm4, 2143289344, %v685_v31  ;;  %v525_v13 = vadd.s32 4294967295, %v509_v0 }
  0x6f   : > { %v239_v3 = vadd.s32 268435455, %v231_v63  ;;  %v367_v15 = vor.u32 %v359_v10, %v159_v5 }
  0x70   : > { %v286_v4 = vor.u32 %v278_v1, %v158_v54  ;;  %vm303_vm6 = vcmp.lt.u32.totalorder %v517_v9, 897  ;;  %vm319_vm7 = vcmp.ge.u32.totalorder %v525_v13, 1151 }
  0x71   : > { %v247_v6 = vshrl.u32 %v239_v3, 29 }
  0x72   : > { %v374_v8 = vsel %vm302_vm3, %v366_v2, %v286_v4 }
  0x73   : > { %v382_v11 = vsel %vm318_vm5, %v158_v54, %v374_v8  ;;  %v255_v12 = vadd.s32 %v247_v6, %v207_v51 }
  0x74   : > { %398 = vst [vmem:[%s834_s25 + $0x30] sm:$0xff] %v382_v11 }
  0x75   : > { %v279_v14 = vadd.s32 %v271_v7, %v255_v12 }
  0x77   : > { %v287_v16 = vor.u32 %v279_v14, %v159_v5 }
  0x79   : > { %v375_v17 = vsel %vm303_vm6, %v367_v15, %v287_v16 }
  0x7a   : > { %v383_v31 = vsel %vm319_vm7, %v159_v5, %v375_v17 }
  0x7b   : > { %399 = vst [vmem:[%s834_s25 + $0x38] sm:$0xff] %v383_v31 }
  0x7c   : > { %626 = shalt.err (!%p623_p3)
}
  0x7d   : > { %s627_s16 = scalar_lea.hbm %s867_s4, 1024  ;;  %s631_s22 = scalar_lea.hbm %s913_s1, 2048 }
  0x7e   : > { %p628_p5 = scmp.ne.s32.totalorder %s867_s4, %s627_s16  ;;  %p632_p9 = scmp.lt.u32.totalorder %s867_s4, %s913_s1 }
  0x7f   : > { %p633_p0 = scmp.lt.u32.totalorder %s631_s22, %s627_s16  ;;  %p635_p6 = scmp.lt.u32.totalorder %s627_s16, %s867_s4 }
  0x80   : > { %p629_p7 = pnand %p628_p5, %p921_p11 }
  0x81   : > { %p634_p2 = por %p633_p0, %p632_p9 }
  0x82   : > { %p630_p8 = pneg %p629_p7 }
  0x83   : > { %p636_p12 = por %p635_p6, %p634_p2 }
  0x85   : > { %p637_p13 = pnand %p636_p12, %p630_p8 }
  0x87   : > { %640 = shalt.err (!%p637_p13)
}
  0x88   : > { %535 = dma.vmem_to_hbm [thread:$0]  (%p921_p11), %s869_s28, 1024, %s867_s4, %s401_s5  }
  0x89 PF: > { %s427_s26 = sand.u32 1, %s667_s6   ;;  %p922_p4 = scmp.ne.s32.totalorder %s918_s19, 0 }
  0x8a   : > { %p923_p10 = scmp.ge.s32.totalorder %s679_s9, 2  ;;  %s428_s30 = scalar_lea.sflag [#allocation4], %s427_s26 }
  0x8c   : > { %p542_p1 = pnand %p923_p10, %p922_p4 }
  0x8e   : > { %662 = dma.done.wait (!%p542_p1), %s428_s30, 1024  }
  0x8f   : > { %664 = vsyncadd (!%p542_p1), %s428_s30, 4294966272  ;;  %p14_p3 = scmp.ge.s32.totalorder %s722_s12, 4   ;;  %s924_s6 = smov %s671_s7 }
  0x90   : > { %s925_s7 = smov %s675_s8  ;;  %s926_s8 = smov %s734_s15 }
  0x91   : > { %s927_s9 = smov %s722_s12  ;;  %16 = sbr.rel (!%p14_p3) target bundleno = 5 (0x5), region = 70 }
  0x98   :  { %433 = vsyncpa [#allocation3], 1 }
  0x99   :  { %435 = vsyncpa [#allocation3 + $0x1], 1 }
  0x9a   :  { %436 = vsyncpa [#allocation4], 1 }
  0x9b   :  { %438 = vsyncpa [#allocation4 + $0x1], 1 }

</bundles_post_ra>
